<compile_context>
chip_gen: v6e
topology: v6e:2x2x1
jax: 0.10.0
libtpu: 0.0.40
codegen_flags: <defaults>
</compile_context>

<pallas_src>
import jax
import jax.numpy as jnp
from jax.experimental import pallas as pl
from jax.experimental.pallas import tpu as pltpu


def _hbm_copy_kernel(x_hbm, o_hbm, sem):
    # Single HBM->HBM DMA of the whole (flattened) array.  No VMEM buffers,
    # no vector load/store work — purely DMA/HBM-bandwidth bound.
    cp = pltpu.make_async_copy(x_hbm, o_hbm, sem)
    cp.start()
    cp.wait()


def reshape_pallas(x, shape):
    """Pallas equivalent of torch.Tensor.view(x.size(0), *shape)."""
    shape = tuple(int(d) for d in shape)
    n = int(x.shape[0])

    flat = 1
    for d in x.shape[1:]:
        flat *= int(d)
    target = 1
    for d in shape:
        target *= d
    assert flat == target, f"cannot view {x.shape} as (N, {shape})"

    # Metadata-only flatten so src/dst shapes match for the DMA.
    x2 = jnp.reshape(x, (n, flat))

    out2 = pl.pallas_call(
        _hbm_copy_kernel,
        out_shape=jax.ShapeDtypeStruct((n, flat), x.dtype),
        in_specs=[pl.BlockSpec(memory_space=pl.ANY)],
        out_specs=pl.BlockSpec(memory_space=pl.ANY),
        scratch_shapes=[pltpu.SemaphoreType.DMA(())],
    )(x2)

    # Final target shape — metadata only.
    return jnp.reshape(out2, (n,) + shape)


class ReShape:
    """Mirror of the PyTorch module."""

    def __init__(self, shape):
        self.shape = tuple(shape)

    def __call__(self, x):
        return reshape_pallas(x, self.shape)


if __name__ == "__main__":
    key = jax.random.PRNGKey(0)

    # Small, module-consistent example: (N, C, H, W) -> (N, 16, 64).
    x = jax.random.normal(key, (2, 4, 16, 16), jnp.float32)
    module = ReShape((16, 64))

    out = module(x)
    out = jax.block_until_ready(out)

    # Correctness against the pure-JAX reference (exact: it is a copy).
    ref = jnp.reshape(x, (x.shape[0], 16, 64))
    assert out.shape == (2, 16, 64), out.shape
    assert out.dtype == x.dtype
    assert jnp.array_equal(out, ref)

    print("KERNEL_OK")
</pallas_src>

<mosaic_0001>
module attributes {stable_mosaic.version = 11 : i64} {
  func.func @_hbm_copy_kernel(%arg0: memref<2x1024xf32, #tpu.memory_space<any>>, %arg1: memref<2x1024xf32, #tpu.memory_space<any>>, %arg2: memref<!tpu.dma_semaphore, #tpu.memory_space<semaphore_mem>>) attributes {dimension_semantics = [], scalar_prefetch = 0 : i64, scratch_operands = 1 : i64, tpu.core_type = #tpu.core_type<tc>} {
    tpu.enqueue_dma source(%arg0 : memref<2x1024xf32, #tpu.memory_space<any>>) target(%arg1 : memref<2x1024xf32, #tpu.memory_space<any>>) target_semaphore(%arg2 : memref<!tpu.dma_semaphore, #tpu.memory_space<semaphore_mem>>)
    tpu.wait_dma2 semaphore(%arg2 : memref<!tpu.dma_semaphore, #tpu.memory_space<semaphore_mem>>) src(%arg0 : memref<2x1024xf32, #tpu.memory_space<any>>) dst(%arg1 : memref<2x1024xf32, #tpu.memory_space<any>>)
    return
  }
}

</mosaic_0001>

<bundles_post_ra>
// kernel: tpu_custom_call.1
= control target key start
LH: loop header
LB: loop body
LE: loop exit
PB: predicated region body
PF: predicated region fallthrough
CT: control target
= control target key end

     0   :  { %s29_s6 = smov [#allocation2]   ;;  %s30_s7 = smov 131072   ;;  %s48_s0 = inlined_call_operand.hbm [shape: f32[2,1024], index: 0, kind: input, shape index: {}]   ;;  %s49_s1 = inlined_call_operand.hbm [shape: f32[2,1024], index: 1, kind: output, shape index: {}]  }
   0x1   :  { %s31_s8 = smov 0  }
   0x2   :  { %12 = dma.general %s48_s0, 256, %s49_s1, %s29_s6, %s30_s7, [#allocation4], %s31_s8, 0  }
   0x3   :  { %27 = dma.done.wait [#allocation2], 256 }
   0x4   :  { %28 = vsyncadd [#allocation2], 4294967040 }
   0x5   :  { %17 = vsyncmov [#allocation2] }
   0x8   :  { %s18_s13 = vpop.sfrf %17 }
   0x9   :  { %p23_p0 = scmp.ne.s32.totalorder %s18_s13, 0 }
   0xb   :  { %22 = shalt.err (%p23_p0)  }

</bundles_post_ra>
